<compile_context>
chip_gen: v7x
topology: tpu7x:2x2x1
jax: 0.10.0
libtpu: 0.0.40
codegen_flags: <defaults>
</compile_context>

<pallas_src>
import functools

import jax
import jax.numpy as jnp
from jax.experimental import pallas as pl
from jax.experimental.pallas import tpu as pltpu

# ----------------------------- model config ---------------------------------
FEATURE_SIZE = [3, 5, 10, 6, 4]        # sex, level_id, shop_id, cate, floor vocab sizes
SOFTMAX_DIMS = 11
EMBEDDING_DIM = 4
HIDDEN_DIMS = [8, 4, 4]
B = 2                                  # batch (toy test size)
L = 8                                  # behaviour-sequence length

IN_RAW = EMBEDDING_DIM * 7             # 28 concatenated feature columns
H_PAD = 16                             # padded hidden / output width (lanes)

# Vocab sizes / column offsets of the fused selection matrix S (one column
# block per feature slot; iter and candidate slots of the same table are
# separate blocks because they feed different w1 rows).
V_SEX = FEATURE_SIZE[0]                # 3
V_LVL = FEATURE_SIZE[1]                # 5
V_SHOP = FEATURE_SIZE[2] + 1           # 11  (padding_idx=0 row is zero)
V_CATE = FEATURE_SIZE[3] + 2           # 8
V_FLOOR = FEATURE_SIZE[4] + 1          # 5
OFF_SEX = 0
OFF_LVL = OFF_SEX + V_SEX              # 3
OFF_ISHOP = OFF_LVL + V_LVL            # 8
OFF_ICATE = OFF_ISHOP + V_SHOP         # 19
OFF_IFLOOR = OFF_ICATE + V_CATE        # 27
OFF_CSHOP = OFF_IFLOOR + V_FLOOR       # 32
OFF_CCATE = OFF_CSHOP + V_SHOP         # 43
V_TOTAL = OFF_CCATE + V_CATE           # 51
V_PAD = 64                             # padded S width / fused-w1 rows

# weight-slab row offsets (all 8-row aligned), 16 lanes wide, bf16
_W1_R0, _W1_R1 = 0, V_PAD                        # (64, 16) fused T @ w1
_W2_R0, _W2_R1 = _W1_R1, _W1_R1 + H_PAD          # (16, 16)
_W3_R0, _W3_R1 = _W2_R1, _W2_R1 + H_PAD          # (16, 16)
_WO_R0, _WO_R1 = _W3_R1, _W3_R1 + H_PAD          # (16, 16) [score | copy-of-x]
W_SLAB_ROWS = _WO_R1                             # 112


# ------------------------------ Pallas kernel -------------------------------
def _youtube_dnn_kernel(sex_ref, lvl_ref, ishop_ref, icate_ref, ifloor_ref,
                        cshop_ref, ccate_ref, w_ref, b_ref, out_ref):
    f32 = jnp.float32
    bf16 = jnp.bfloat16
    tb = out_ref.shape[0]

    # Selection / count matrix S: S[b, off_f + id] += 1 for every feature id.
    # feat = S @ T_cat, so layer 1 (feat @ w1) becomes S @ (T_cat @ w1).
    col = jax.lax.broadcasted_iota(jnp.int32, (tb, V_PAD), 1)

    def onehot(ids, off):                       # ids: (tb, 1) int32
        return (col == (ids + off)).astype(f32)

    s = onehot(sex_ref[...], OFF_SEX)
    s = s + onehot(lvl_ref[...], OFF_LVL)
    for l in range(L):                          # behaviour-sequence sum pool
        s = s + onehot(ishop_ref[:, l:l + 1], OFF_ISHOP)
        s = s + onehot(icate_ref[:, l:l + 1], OFF_ICATE)
        s = s + onehot(ifloor_ref[:, l:l + 1], OFF_IFLOOR)
    s = s + onehot(cshop_ref[...], OFF_CSHOP)
    s = s + onehot(ccate_ref[...], OFF_CCATE)

    # MLP: bf16 operands on the MXU, f32 accumulation / bias / ReLU.
    h = jnp.dot(s.astype(bf16), w_ref[_W1_R0:_W1_R1, :],
                preferred_element_type=f32)
    h = jnp.maximum(h + b_ref[0:1, :], 0.0)
    h = jnp.dot(h.astype(bf16), w_ref[_W2_R0:_W2_R1, :],
                preferred_element_type=f32)
    h = jnp.maximum(h + b_ref[1:2, :], 0.0)
    h = jnp.dot(h.astype(bf16), w_ref[_W3_R0:_W3_R1, :],
                preferred_element_type=f32)
    x = jnp.maximum(h + b_ref[2:3, :], 0.0)     # user embedding (cols 4:16 zero)

    # Combined output layer: cols 0:11 = score, cols 11:15 = x (identity copy).
    out = jnp.dot(x.astype(bf16), w_ref[_WO_R0:_WO_R1, :],
                  preferred_element_type=f32) + b_ref[3:4, :]
    out_ref[...] = out.astype(out_ref.dtype)    # single lane-dense store


# --------------------------- parameter construction --------------------------
def init_params(key):
    ks = jax.random.split(key, 16)

    def table(k, n, pad0=False):
        t = jax.random.normal(k, (n, EMBEDDING_DIM), jnp.float32) * 0.1
        if pad0:
            t = t.at[0].set(0.0)  # nn.Embedding padding_idx=0 rows are zero
        return t

    params = {
        "embed_sex": table(ks[0], FEATURE_SIZE[0]),
        "embed_level_id": table(ks[1], FEATURE_SIZE[1]),
        "embed_shop_id": table(ks[2], FEATURE_SIZE[2] + 1, pad0=True),
        "embed_cate": table(ks[3], FEATURE_SIZE[3] + 2, pad0=True),
        "embed_floor": table(ks[4], FEATURE_SIZE[4] + 1, pad0=True),
    }

    def linear(kw, kb, fan_in, fan_out):
        w = jax.random.normal(kw, (fan_in, fan_out), jnp.float32) * 0.1
        b = jax.random.normal(kb, (1, fan_out), jnp.float32) * 0.01
        return w, b

    params["w1"], params["b1"] = linear(ks[5], ks[6], IN_RAW, HIDDEN_DIMS[0])
    params["w2"], params["b2"] = linear(ks[7], ks[8], HIDDEN_DIMS[0], HIDDEN_DIMS[1])
    params["w3"], params["b3"] = linear(ks[9], ks[10], HIDDEN_DIMS[1], HIDDEN_DIMS[2])
    params["wo"], params["bo"] = linear(ks[11], ks[12], HIDDEN_DIMS[2], SOFTMAX_DIMS)
    return params


def _pad_block(a, rows, cols):
    out = jnp.zeros((rows, cols), jnp.float32)
    return out.at[: a.shape[0], : a.shape[1]].set(a)


def pack_params(params):
    """Pack all weights into one bf16 VMEM slab + one f32 bias slab."""
    # Stacked embedding tables laid out as T_cat (V_PAD, 28): one 4-wide
    # column block per feature slot, then fold into the first layer.
    t = jnp.zeros((V_PAD, IN_RAW), jnp.float32)
    t = t.at[OFF_SEX:OFF_SEX + V_SEX, 0:4].set(params["embed_sex"])
    t = t.at[OFF_LVL:OFF_LVL + V_LVL, 4:8].set(params["embed_level_id"])
    t = t.at[OFF_ISHOP:OFF_ISHOP + V_SHOP, 8:12].set(params["embed_shop_id"])
    t = t.at[OFF_ICATE:OFF_ICATE + V_CATE, 12:16].set(params["embed_cate"])
    t = t.at[OFF_IFLOOR:OFF_IFLOOR + V_FLOOR, 16:20].set(params["embed_floor"])
    t = t.at[OFF_CSHOP:OFF_CSHOP + V_SHOP, 20:24].set(params["embed_shop_id"])
    t = t.at[OFF_CCATE:OFF_CCATE + V_CATE, 24:28].set(params["embed_cate"])
    w1_fused = t @ params["w1"]                                   # (64, 8)

    # Widened output layer: cols 0:11 = wo (score), cols 11:15 = identity so
    # the same matmul also emits a copy of x (exact: 1.0 is exact in bf16).
    wo_comb = jnp.zeros((HIDDEN_DIMS[2], H_PAD), jnp.float32)
    wo_comb = wo_comb.at[:, :SOFTMAX_DIMS].set(params["wo"])
    wo_comb = wo_comb.at[:, SOFTMAX_DIMS:SOFTMAX_DIMS + HIDDEN_DIMS[2]].set(
        jnp.eye(HIDDEN_DIMS[2], dtype=jnp.float32))

    w_slab = jnp.concatenate(
        [
            _pad_block(w1_fused, V_PAD, H_PAD),        # rows   0: 64
            _pad_block(params["w2"], H_PAD, H_PAD),    # rows  64: 80
            _pad_block(params["w3"], H_PAD, H_PAD),    # rows  80: 96
            _pad_block(wo_comb, H_PAD, H_PAD),         # rows  96:112
        ],
        axis=0,
    ).astype(jnp.bfloat16)                             # (112, 16) bf16

    b_slab = jnp.concatenate(
        [
            _pad_block(params["b1"], 1, H_PAD),
            _pad_block(params["b2"], 1, H_PAD),
            _pad_block(params["bo"], 0, H_PAD)[:0],    # placeholder keeps layout explicit
        ][:2]
        + [
            _pad_block(params["b3"], 1, H_PAD),
            _pad_block(params["bo"], 1, H_PAD),        # cols 11:16 stay zero (x copy)
            jnp.zeros((4, H_PAD), jnp.float32),        # pad rows to 8
        ],
        axis=0,
    )                                                  # (8, 16) f32
    return w_slab, b_slab


# ------------------------------- forward wrapper -----------------------------
def _round_up(n, m):
    return (n + m - 1) // m * m


@functools.partial(jax.jit, static_argnames=("tile_b",))
def youtube_dnn_forward(w_slab, b_slab,
                        cat_fea_sex, cat_fea_level_id,
                        iter_fea_shop_id, iter_fea_cate, iter_fea_floor,
                        candidate_shop_id, candidate_cate, *, tile_b=1024):
    batch = cat_fea_sex.shape[0]
    tb = min(tile_b, _round_up(batch, 8))     # batch tile (multiple of 8/16)
    bp = _round_up(batch, tb)                 # padded batch

    def prep(a):                              # int ids -> zero-padded (bp, ·) int32
        a = jnp.asarray(a, jnp.int32)
        if a.ndim == 1:
            a = a[:, None]
        return jnp.pad(a, ((0, bp - batch), (0, 0)))

    ids = [prep(cat_fea_sex), prep(cat_fea_level_id),
           prep(iter_fea_shop_id), prep(iter_fea_cate), prep(iter_fea_floor),
           prep(candidate_shop_id), prep(candidate_cate)]

    id_specs = [pl.BlockSpec((tb, a.shape[1]), lambda i: (i, 0)) for a in ids]

    out = pl.pallas_call(
        _youtube_dnn_kernel,
        out_shape=jax.ShapeDtypeStruct((bp, H_PAD), jnp.bfloat16),
        grid=(bp // tb,),
        in_specs=id_specs + [
            # Weight / bias slabs: same block every step -> VMEM-resident.
            pl.BlockSpec((W_SLAB_ROWS, H_PAD), lambda i: (0, 0)),
            pl.BlockSpec((8, H_PAD), lambda i: (0, 0)),
        ],
        out_specs=pl.BlockSpec((tb, H_PAD), lambda i: (i, 0)),
        compiler_params=pltpu.CompilerParams(
            dimension_semantics=("parallel",)),   # megacore-shards batch tiles on v7x
    )(*ids, w_slab, b_slab)

    score = out[:batch, :SOFTMAX_DIMS].astype(jnp.float32)
    x = out[:batch, SOFTMAX_DIMS:SOFTMAX_DIMS + HIDDEN_DIMS[2]].astype(jnp.float32)
    return score, x


# ------------------------------ pure-JAX reference ---------------------------
def youtube_dnn_reference(params, cat_fea_sex, cat_fea_level_id,
                          iter_fea_shop_id, iter_fea_cate, iter_fea_floor,
                          candidate_shop_id, candidate_cate):
    emb_sex = params["embed_sex"][cat_fea_sex]
    emb_level = params["embed_level_id"][cat_fea_level_id]
    shop_sum = params["embed_shop_id"][iter_fea_shop_id].sum(1)
    cate_sum = params["embed_cate"][iter_fea_cate].sum(1)
    floor_sum = params["embed_floor"][iter_fea_floor].sum(1)
    cand_shop = params["embed_shop_id"][candidate_shop_id]
    cand_cate = params["embed_cate"][candidate_cate]
    emb_cat = jnp.concatenate(
        [emb_sex, emb_level, shop_sum, cate_sum, floor_sum, cand_shop, cand_cate],
        axis=1)
    h = jnp.maximum(emb_cat @ params["w1"] + params["b1"], 0.0)
    h = jnp.maximum(h @ params["w2"] + params["b2"], 0.0)
    h = jnp.maximum(h @ params["w3"] + params["b3"], 0.0)
    score = h @ params["wo"] + params["bo"]
    return score, h


# ------------------------------------ main ------------------------------------
if __name__ == "__main__":
    key = jax.random.PRNGKey(0)
    kp, k1, k2, k3, k4, k5, k6, k7 = jax.random.split(key, 8)

    params = init_params(kp)
    w_slab, b_slab = pack_params(params)      # packed once, reused every call

    cat_fea_sex = jax.random.randint(k1, (B,), 0, FEATURE_SIZE[0], jnp.int32)
    cat_fea_level_id = jax.random.randint(k2, (B,), 0, FEATURE_SIZE[1], jnp.int32)
    iter_fea_shop_id = jax.random.randint(k3, (B, L), 0, FEATURE_SIZE[2] + 1, jnp.int32)
    iter_fea_cate = jax.random.randint(k4, (B, L), 0, FEATURE_SIZE[3] + 2, jnp.int32)
    iter_fea_floor = jax.random.randint(k5, (B, L), 0, FEATURE_SIZE[4] + 1, jnp.int32)
    candidate_shop_id = jax.random.randint(k6, (B,), 1, FEATURE_SIZE[2] + 1, jnp.int32)
    candidate_cate = jax.random.randint(k7, (B,), 1, FEATURE_SIZE[3] + 2, jnp.int32)

    args = (cat_fea_sex, cat_fea_level_id, iter_fea_shop_id, iter_fea_cate,
            iter_fea_floor, candidate_shop_id, candidate_cate)

    score, x = youtube_dnn_forward(w_slab, b_slab, *args)
    jax.block_until_ready((score, x))

    score_ref, x_ref = youtube_dnn_reference(params, *args)
    # bf16-streamed weights / outputs -> relaxed tolerance vs. the f32 reference.
    assert jnp.allclose(score, score_ref, atol=1e-2, rtol=1e-2), "score mismatch"
    assert jnp.allclose(x, x_ref, atol=1e-2, rtol=1e-2), "hidden mismatch"

    print("KERNEL_OK")
</pallas_src>

<mosaic_0001>
module attributes {stable_mosaic.version = 11 : i64} {
  func.func @_youtube_dnn_kernel(%arg0: i32, %arg1: memref<8x1xi32, #tpu.memory_space<vmem>>, %arg2: memref<8x1xi32, #tpu.memory_space<vmem>>, %arg3: memref<8x8xi32, #tpu.memory_space<vmem>>, %arg4: memref<8x8xi32, #tpu.memory_space<vmem>>, %arg5: memref<8x8xi32, #tpu.memory_space<vmem>>, %arg6: memref<8x1xi32, #tpu.memory_space<vmem>>, %arg7: memref<8x1xi32, #tpu.memory_space<vmem>>, %arg8: memref<112x16xbf16, #tpu.memory_space<vmem>>, %arg9: memref<8x16xf32, #tpu.memory_space<vmem>>, %arg10: memref<8x16xbf16, #tpu.memory_space<vmem>>) attributes {dimension_semantics = [#tpu.dimension_semantics<parallel>], iteration_bounds = array<i64: 1>, scalar_prefetch = 0 : i64, scratch_operands = 0 : i64, tpu.core_type = #tpu.core_type<tc>, window_params = [{transform_indices = @transform_0, window_bounds = array<i64: 8, 1>}, {transform_indices = @transform_1, window_bounds = array<i64: 8, 1>}, {transform_indices = @transform_2, window_bounds = array<i64: 8, 8>}, {transform_indices = @transform_3, window_bounds = array<i64: 8, 8>}, {transform_indices = @transform_4, window_bounds = array<i64: 8, 8>}, {transform_indices = @transform_5, window_bounds = array<i64: 8, 1>}, {transform_indices = @transform_6, window_bounds = array<i64: 8, 1>}, {pipeline_mode = #tpu.pipeline_mode<synchronous>, transform_indices = @transform_7, window_bounds = array<i64: 112, 16>}, {pipeline_mode = #tpu.pipeline_mode<synchronous>, transform_indices = @transform_8, window_bounds = array<i64: 8, 16>}, {transform_indices = @transform_9, window_bounds = array<i64: 8, 16>}]} {
    %0 = tpu.iota {dimensions = array<i32: 1>} : vector<8x64xi32>
    %c0 = arith.constant 0 : index
    %c0_0 = arith.constant 0 : index
    %1 = vector.load %arg1[%c0, %c0_0] : memref<8x1xi32, #tpu.memory_space<vmem>>, vector<8x1xi32>
    %c0_i32 = arith.constant 0 : i32
    %2 = vector.broadcast %c0_i32 : i32 to vector<8x1xi32>
    %3 = arith.addi %1, %2 : vector<8x1xi32>
    %4 = vector.broadcast %3 : vector<8x1xi32> to vector<8x64xi32>
    %5 = arith.cmpi eq, %0, %4 : vector<8x64xi32>
    %6 = arith.extui %5 : vector<8x64xi1> to vector<8x64xi32>
    %7 = arith.sitofp %6 : vector<8x64xi32> to vector<8x64xf32>
    %c0_1 = arith.constant 0 : index
    %c0_2 = arith.constant 0 : index
    %8 = vector.load %arg2[%c0_1, %c0_2] : memref<8x1xi32, #tpu.memory_space<vmem>>, vector<8x1xi32>
    %c3_i32 = arith.constant 3 : i32
    %9 = vector.broadcast %c3_i32 : i32 to vector<8x1xi32>
    %10 = arith.addi %8, %9 : vector<8x1xi32>
    %11 = vector.broadcast %10 : vector<8x1xi32> to vector<8x64xi32>
    %12 = arith.cmpi eq, %0, %11 : vector<8x64xi32>
    %13 = arith.extui %12 : vector<8x64xi1> to vector<8x64xi32>
    %14 = arith.sitofp %13 : vector<8x64xi32> to vector<8x64xf32>
    %15 = arith.addf %7, %14 : vector<8x64xf32>
    %c0_3 = arith.constant 0 : index
    %c0_4 = arith.constant 0 : index
    %16 = vector.load %arg3[%c0_3, %c0_4] : memref<8x8xi32, #tpu.memory_space<vmem>>, vector<8x1xi32>
    %c8_i32 = arith.constant 8 : i32
    %17 = vector.broadcast %c8_i32 : i32 to vector<8x1xi32>
    %18 = arith.addi %16, %17 : vector<8x1xi32>
    %19 = vector.broadcast %18 : vector<8x1xi32> to vector<8x64xi32>
    %20 = arith.cmpi eq, %0, %19 : vector<8x64xi32>
    %21 = arith.extui %20 : vector<8x64xi1> to vector<8x64xi32>
    %22 = arith.sitofp %21 : vector<8x64xi32> to vector<8x64xf32>
    %23 = arith.addf %15, %22 : vector<8x64xf32>
    %c0_5 = arith.constant 0 : index
    %c0_6 = arith.constant 0 : index
    %24 = vector.load %arg4[%c0_5, %c0_6] : memref<8x8xi32, #tpu.memory_space<vmem>>, vector<8x1xi32>
    %c19_i32 = arith.constant 19 : i32
    %25 = vector.broadcast %c19_i32 : i32 to vector<8x1xi32>
    %26 = arith.addi %24, %25 : vector<8x1xi32>
    %27 = vector.broadcast %26 : vector<8x1xi32> to vector<8x64xi32>
    %28 = arith.cmpi eq, %0, %27 : vector<8x64xi32>
    %29 = arith.extui %28 : vector<8x64xi1> to vector<8x64xi32>
    %30 = arith.sitofp %29 : vector<8x64xi32> to vector<8x64xf32>
    %31 = arith.addf %23, %30 : vector<8x64xf32>
    %c0_7 = arith.constant 0 : index
    %c0_8 = arith.constant 0 : index
    %32 = vector.load %arg5[%c0_7, %c0_8] : memref<8x8xi32, #tpu.memory_space<vmem>>, vector<8x1xi32>
    %c27_i32 = arith.constant 27 : i32
    %33 = vector.broadcast %c27_i32 : i32 to vector<8x1xi32>
    %34 = arith.addi %32, %33 : vector<8x1xi32>
    %35 = vector.broadcast %34 : vector<8x1xi32> to vector<8x64xi32>
    %36 = arith.cmpi eq, %0, %35 : vector<8x64xi32>
    %37 = arith.extui %36 : vector<8x64xi1> to vector<8x64xi32>
    %38 = arith.sitofp %37 : vector<8x64xi32> to vector<8x64xf32>
    %39 = arith.addf %31, %38 : vector<8x64xf32>
    %c0_9 = arith.constant 0 : index
    %c1 = arith.constant 1 : index
    %40 = vector.load %arg3[%c0_9, %c1] : memref<8x8xi32, #tpu.memory_space<vmem>>, vector<8x1xi32>
    %c8_i32_10 = arith.constant 8 : i32
    %41 = vector.broadcast %c8_i32_10 : i32 to vector<8x1xi32>
    %42 = arith.addi %40, %41 : vector<8x1xi32>
    %43 = vector.broadcast %42 : vector<8x1xi32> to vector<8x64xi32>
    %44 = arith.cmpi eq, %0, %43 : vector<8x64xi32>
    %45 = arith.extui %44 : vector<8x64xi1> to vector<8x64xi32>
    %46 = arith.sitofp %45 : vector<8x64xi32> to vector<8x64xf32>
    %47 = arith.addf %39, %46 : vector<8x64xf32>
    %c0_11 = arith.constant 0 : index
    %c1_12 = arith.constant 1 : index
    %48 = vector.load %arg4[%c0_11, %c1_12] : memref<8x8xi32, #tpu.memory_space<vmem>>, vector<8x1xi32>
    %c19_i32_13 = arith.constant 19 : i32
    %49 = vector.broadcast %c19_i32_13 : i32 to vector<8x1xi32>
    %50 = arith.addi %48, %49 : vector<8x1xi32>
    %51 = vector.broadcast %50 : vector<8x1xi32> to vector<8x64xi32>
    %52 = arith.cmpi eq, %0, %51 : vector<8x64xi32>
    %53 = arith.extui %52 : vector<8x64xi1> to vector<8x64xi32>
    %54 = arith.sitofp %53 : vector<8x64xi32> to vector<8x64xf32>
    %55 = arith.addf %47, %54 : vector<8x64xf32>
    %c0_14 = arith.constant 0 : index
    %c1_15 = arith.constant 1 : index
    %56 = vector.load %arg5[%c0_14, %c1_15] : memref<8x8xi32, #tpu.memory_space<vmem>>, vector<8x1xi32>
    %c27_i32_16 = arith.constant 27 : i32
    %57 = vector.broadcast %c27_i32_16 : i32 to vector<8x1xi32>
    %58 = arith.addi %56, %57 : vector<8x1xi32>
    %59 = vector.broadcast %58 : vector<8x1xi32> to vector<8x64xi32>
    %60 = arith.cmpi eq, %0, %59 : vector<8x64xi32>
    %61 = arith.extui %60 : vector<8x64xi1> to vector<8x64xi32>
    %62 = arith.sitofp %61 : vector<8x64xi32> to vector<8x64xf32>
    %63 = arith.addf %55, %62 : vector<8x64xf32>
    %c0_17 = arith.constant 0 : index
    %c2 = arith.constant 2 : index
    %64 = vector.load %arg3[%c0_17, %c2] : memref<8x8xi32, #tpu.memory_space<vmem>>, vector<8x1xi32>
    %c8_i32_18 = arith.constant 8 : i32
    %65 = vector.broadcast %c8_i32_18 : i32 to vector<8x1xi32>
    %66 = arith.addi %64, %65 : vector<8x1xi32>
    %67 = vector.broadcast %66 : vector<8x1xi32> to vector<8x64xi32>
    %68 = arith.cmpi eq, %0, %67 : vector<8x64xi32>
    %69 = arith.extui %68 : vector<8x64xi1> to vector<8x64xi32>
    %70 = arith.sitofp %69 : vector<8x64xi32> to vector<8x64xf32>
    %71 = arith.addf %63, %70 : vector<8x64xf32>
    %c0_19 = arith.constant 0 : index
    %c2_20 = arith.constant 2 : index
    %72 = vector.load %arg4[%c0_19, %c2_20] : memref<8x8xi32, #tpu.memory_space<vmem>>, vector<8x1xi32>
    %c19_i32_21 = arith.constant 19 : i32
    %73 = vector.broadcast %c19_i32_21 : i32 to vector<8x1xi32>
    %74 = arith.addi %72, %73 : vector<8x1xi32>
    %75 = vector.broadcast %74 : vector<8x1xi32> to vector<8x64xi32>
    %76 = arith.cmpi eq, %0, %75 : vector<8x64xi32>
    %77 = arith.extui %76 : vector<8x64xi1> to vector<8x64xi32>
    %78 = arith.sitofp %77 : vector<8x64xi32> to vector<8x64xf32>
    %79 = arith.addf %71, %78 : vector<8x64xf32>
    %c0_22 = arith.constant 0 : index
    %c2_23 = arith.constant 2 : index
    %80 = vector.load %arg5[%c0_22, %c2_23] : memref<8x8xi32, #tpu.memory_space<vmem>>, vector<8x1xi32>
    %c27_i32_24 = arith.constant 27 : i32
    %81 = vector.broadcast %c27_i32_24 : i32 to vector<8x1xi32>
    %82 = arith.addi %80, %81 : vector<8x1xi32>
    %83 = vector.broadcast %82 : vector<8x1xi32> to vector<8x64xi32>
    %84 = arith.cmpi eq, %0, %83 : vector<8x64xi32>
    %85 = arith.extui %84 : vector<8x64xi1> to vector<8x64xi32>
    %86 = arith.sitofp %85 : vector<8x64xi32> to vector<8x64xf32>
    %87 = arith.addf %79, %86 : vector<8x64xf32>
    %c0_25 = arith.constant 0 : index
    %c3 = arith.constant 3 : index
    %88 = vector.load %arg3[%c0_25, %c3] : memref<8x8xi32, #tpu.memory_space<vmem>>, vector<8x1xi32>
    %c8_i32_26 = arith.constant 8 : i32
    %89 = vector.broadcast %c8_i32_26 : i32 to vector<8x1xi32>
    %90 = arith.addi %88, %89 : vector<8x1xi32>
    %91 = vector.broadcast %90 : vector<8x1xi32> to vector<8x64xi32>
    %92 = arith.cmpi eq, %0, %91 : vector<8x64xi32>
    %93 = arith.extui %92 : vector<8x64xi1> to vector<8x64xi32>
    %94 = arith.sitofp %93 : vector<8x64xi32> to vector<8x64xf32>
    %95 = arith.addf %87, %94 : vector<8x64xf32>
    %c0_27 = arith.constant 0 : index
    %c3_28 = arith.constant 3 : index
    %96 = vector.load %arg4[%c0_27, %c3_28] : memref<8x8xi32, #tpu.memory_space<vmem>>, vector<8x1xi32>
    %c19_i32_29 = arith.constant 19 : i32
    %97 = vector.broadcast %c19_i32_29 : i32 to vector<8x1xi32>
    %98 = arith.addi %96, %97 : vector<8x1xi32>
    %99 = vector.broadcast %98 : vector<8x1xi32> to vector<8x64xi32>
    %100 = arith.cmpi eq, %0, %99 : vector<8x64xi32>
    %101 = arith.extui %100 : vector<8x64xi1> to vector<8x64xi32>
    %102 = arith.sitofp %101 : vector<8x64xi32> to vector<8x64xf32>
    %103 = arith.addf %95, %102 : vector<8x64xf32>
    %c0_30 = arith.constant 0 : index
    %c3_31 = arith.constant 3 : index
    %104 = vector.load %arg5[%c0_30, %c3_31] : memref<8x8xi32, #tpu.memory_space<vmem>>, vector<8x1xi32>
    %c27_i32_32 = arith.constant 27 : i32
    %105 = vector.broadcast %c27_i32_32 : i32 to vector<8x1xi32>
    %106 = arith.addi %104, %105 : vector<8x1xi32>
    %107 = vector.broadcast %106 : vector<8x1xi32> to vector<8x64xi32>
    %108 = arith.cmpi eq, %0, %107 : vector<8x64xi32>
    %109 = arith.extui %108 : vector<8x64xi1> to vector<8x64xi32>
    %110 = arith.sitofp %109 : vector<8x64xi32> to vector<8x64xf32>
    %111 = arith.addf %103, %110 : vector<8x64xf32>
    %c0_33 = arith.constant 0 : index
    %c4 = arith.constant 4 : index
    %112 = vector.load %arg3[%c0_33, %c4] : memref<8x8xi32, #tpu.memory_space<vmem>>, vector<8x1xi32>
    %c8_i32_34 = arith.constant 8 : i32
    %113 = vector.broadcast %c8_i32_34 : i32 to vector<8x1xi32>
    %114 = arith.addi %112, %113 : vector<8x1xi32>
    %115 = vector.broadcast %114 : vector<8x1xi32> to vector<8x64xi32>
    %116 = arith.cmpi eq, %0, %115 : vector<8x64xi32>
    %117 = arith.extui %116 : vector<8x64xi1> to vector<8x64xi32>
    %118 = arith.sitofp %117 : vector<8x64xi32> to vector<8x64xf32>
    %119 = arith.addf %111, %118 : vector<8x64xf32>
    %c0_35 = arith.constant 0 : index
    %c4_36 = arith.constant 4 : index
    %120 = vector.load %arg4[%c0_35, %c4_36] : memref<8x8xi32, #tpu.memory_space<vmem>>, vector<8x1xi32>
    %c19_i32_37 = arith.constant 19 : i32
    %121 = vector.broadcast %c19_i32_37 : i32 to vector<8x1xi32>
    %122 = arith.addi %120, %121 : vector<8x1xi32>
    %123 = vector.broadcast %122 : vector<8x1xi32> to vector<8x64xi32>
    %124 = arith.cmpi eq, %0, %123 : vector<8x64xi32>
    %125 = arith.extui %124 : vector<8x64xi1> to vector<8x64xi32>
    %126 = arith.sitofp %125 : vector<8x64xi32> to vector<8x64xf32>
    %127 = arith.addf %119, %126 : vector<8x64xf32>
    %c0_38 = arith.constant 0 : index
    %c4_39 = arith.constant 4 : index
    %128 = vector.load %arg5[%c0_38, %c4_39] : memref<8x8xi32, #tpu.memory_space<vmem>>, vector<8x1xi32>
    %c27_i32_40 = arith.constant 27 : i32
    %129 = vector.broadcast %c27_i32_40 : i32 to vector<8x1xi32>
    %130 = arith.addi %128, %129 : vector<8x1xi32>
    %131 = vector.broadcast %130 : vector<8x1xi32> to vector<8x64xi32>
    %132 = arith.cmpi eq, %0, %131 : vector<8x64xi32>
    %133 = arith.extui %132 : vector<8x64xi1> to vector<8x64xi32>
    %134 = arith.sitofp %133 : vector<8x64xi32> to vector<8x64xf32>
    %135 = arith.addf %127, %134 : vector<8x64xf32>
    %c0_41 = arith.constant 0 : index
    %c5 = arith.constant 5 : index
    %136 = vector.load %arg3[%c0_41, %c5] : memref<8x8xi32, #tpu.memory_space<vmem>>, vector<8x1xi32>
    %c8_i32_42 = arith.constant 8 : i32
    %137 = vector.broadcast %c8_i32_42 : i32 to vector<8x1xi32>
    %138 = arith.addi %136, %137 : vector<8x1xi32>
    %139 = vector.broadcast %138 : vector<8x1xi32> to vector<8x64xi32>
    %140 = arith.cmpi eq, %0, %139 : vector<8x64xi32>
    %141 = arith.extui %140 : vector<8x64xi1> to vector<8x64xi32>
    %142 = arith.sitofp %141 : vector<8x64xi32> to vector<8x64xf32>
    %143 = arith.addf %135, %142 : vector<8x64xf32>
    %c0_43 = arith.constant 0 : index
    %c5_44 = arith.constant 5 : index
    %144 = vector.load %arg4[%c0_43, %c5_44] : memref<8x8xi32, #tpu.memory_space<vmem>>, vector<8x1xi32>
    %c19_i32_45 = arith.constant 19 : i32
    %145 = vector.broadcast %c19_i32_45 : i32 to vector<8x1xi32>
    %146 = arith.addi %144, %145 : vector<8x1xi32>
    %147 = vector.broadcast %146 : vector<8x1xi32> to vector<8x64xi32>
    %148 = arith.cmpi eq, %0, %147 : vector<8x64xi32>
    %149 = arith.extui %148 : vector<8x64xi1> to vector<8x64xi32>
    %150 = arith.sitofp %149 : vector<8x64xi32> to vector<8x64xf32>
    %151 = arith.addf %143, %150 : vector<8x64xf32>
    %c0_46 = arith.constant 0 : index
    %c5_47 = arith.constant 5 : index
    %152 = vector.load %arg5[%c0_46, %c5_47] : memref<8x8xi32, #tpu.memory_space<vmem>>, vector<8x1xi32>
    %c27_i32_48 = arith.constant 27 : i32
    %153 = vector.broadcast %c27_i32_48 : i32 to vector<8x1xi32>
    %154 = arith.addi %152, %153 : vector<8x1xi32>
    %155 = vector.broadcast %154 : vector<8x1xi32> to vector<8x64xi32>
    %156 = arith.cmpi eq, %0, %155 : vector<8x64xi32>
    %157 = arith.extui %156 : vector<8x64xi1> to vector<8x64xi32>
    %158 = arith.sitofp %157 : vector<8x64xi32> to vector<8x64xf32>
    %159 = arith.addf %151, %158 : vector<8x64xf32>
    %c0_49 = arith.constant 0 : index
    %c6 = arith.constant 6 : index
    %160 = vector.load %arg3[%c0_49, %c6] : memref<8x8xi32, #tpu.memory_space<vmem>>, vector<8x1xi32>
    %c8_i32_50 = arith.constant 8 : i32
    %161 = vector.broadcast %c8_i32_50 : i32 to vector<8x1xi32>
    %162 = arith.addi %160, %161 : vector<8x1xi32>
    %163 = vector.broadcast %162 : vector<8x1xi32> to vector<8x64xi32>
    %164 = arith.cmpi eq, %0, %163 : vector<8x64xi32>
    %165 = arith.extui %164 : vector<8x64xi1> to vector<8x64xi32>
    %166 = arith.sitofp %165 : vector<8x64xi32> to vector<8x64xf32>
    %167 = arith.addf %159, %166 : vector<8x64xf32>
    %c0_51 = arith.constant 0 : index
    %c6_52 = arith.constant 6 : index
    %168 = vector.load %arg4[%c0_51, %c6_52] : memref<8x8xi32, #tpu.memory_space<vmem>>, vector<8x1xi32>
    %c19_i32_53 = arith.constant 19 : i32
    %169 = vector.broadcast %c19_i32_53 : i32 to vector<8x1xi32>
    %170 = arith.addi %168, %169 : vector<8x1xi32>
    %171 = vector.broadcast %170 : vector<8x1xi32> to vector<8x64xi32>
    %172 = arith.cmpi eq, %0, %171 : vector<8x64xi32>
    %173 = arith.extui %172 : vector<8x64xi1> to vector<8x64xi32>
    %174 = arith.sitofp %173 : vector<8x64xi32> to vector<8x64xf32>
    %175 = arith.addf %167, %174 : vector<8x64xf32>
    %c0_54 = arith.constant 0 : index
    %c6_55 = arith.constant 6 : index
    %176 = vector.load %arg5[%c0_54, %c6_55] : memref<8x8xi32, #tpu.memory_space<vmem>>, vector<8x1xi32>
    %c27_i32_56 = arith.constant 27 : i32
    %177 = vector.broadcast %c27_i32_56 : i32 to vector<8x1xi32>
    %178 = arith.addi %176, %177 : vector<8x1xi32>
    %179 = vector.broadcast %178 : vector<8x1xi32> to vector<8x64xi32>
    %180 = arith.cmpi eq, %0, %179 : vector<8x64xi32>
    %181 = arith.extui %180 : vector<8x64xi1> to vector<8x64xi32>
    %182 = arith.sitofp %181 : vector<8x64xi32> to vector<8x64xf32>
    %183 = arith.addf %175, %182 : vector<8x64xf32>
    %c0_57 = arith.constant 0 : index
    %c7 = arith.constant 7 : index
    %184 = vector.load %arg3[%c0_57, %c7] : memref<8x8xi32, #tpu.memory_space<vmem>>, vector<8x1xi32>
    %c8_i32_58 = arith.constant 8 : i32
    %185 = vector.broadcast %c8_i32_58 : i32 to vector<8x1xi32>
    %186 = arith.addi %184, %185 : vector<8x1xi32>
    %187 = vector.broadcast %186 : vector<8x1xi32> to vector<8x64xi32>
    %188 = arith.cmpi eq, %0, %187 : vector<8x64xi32>
    %189 = arith.extui %188 : vector<8x64xi1> to vector<8x64xi32>
    %190 = arith.sitofp %189 : vector<8x64xi32> to vector<8x64xf32>
    %191 = arith.addf %183, %190 : vector<8x64xf32>
    %c0_59 = arith.constant 0 : index
    %c7_60 = arith.constant 7 : index
    %192 = vector.load %arg4[%c0_59, %c7_60] : memref<8x8xi32, #tpu.memory_space<vmem>>, vector<8x1xi32>
    %c19_i32_61 = arith.constant 19 : i32
    %193 = vector.broadcast %c19_i32_61 : i32 to vector<8x1xi32>
    %194 = arith.addi %192, %193 : vector<8x1xi32>
    %195 = vector.broadcast %194 : vector<8x1xi32> to vector<8x64xi32>
    %196 = arith.cmpi eq, %0, %195 : vector<8x64xi32>
    %197 = arith.extui %196 : vector<8x64xi1> to vector<8x64xi32>
    %198 = arith.sitofp %197 : vector<8x64xi32> to vector<8x64xf32>
    %199 = arith.addf %191, %198 : vector<8x64xf32>
    %c0_62 = arith.constant 0 : index
    %c7_63 = arith.constant 7 : index
    %200 = vector.load %arg5[%c0_62, %c7_63] : memref<8x8xi32, #tpu.memory_space<vmem>>, vector<8x1xi32>
    %c27_i32_64 = arith.constant 27 : i32
    %201 = vector.broadcast %c27_i32_64 : i32 to vector<8x1xi32>
    %202 = arith.addi %200, %201 : vector<8x1xi32>
    %203 = vector.broadcast %202 : vector<8x1xi32> to vector<8x64xi32>
    %204 = arith.cmpi eq, %0, %203 : vector<8x64xi32>
    %205 = arith.extui %204 : vector<8x64xi1> to vector<8x64xi32>
    %206 = arith.sitofp %205 : vector<8x64xi32> to vector<8x64xf32>
    %207 = arith.addf %199, %206 : vector<8x64xf32>
    %c0_65 = arith.constant 0 : index
    %c0_66 = arith.constant 0 : index
    %208 = vector.load %arg6[%c0_65, %c0_66] : memref<8x1xi32, #tpu.memory_space<vmem>>, vector<8x1xi32>
    %c32_i32 = arith.constant 32 : i32
    %209 = vector.broadcast %c32_i32 : i32 to vector<8x1xi32>
    %210 = arith.addi %208, %209 : vector<8x1xi32>
    %211 = vector.broadcast %210 : vector<8x1xi32> to vector<8x64xi32>
    %212 = arith.cmpi eq, %0, %211 : vector<8x64xi32>
    %213 = arith.extui %212 : vector<8x64xi1> to vector<8x64xi32>
    %214 = arith.sitofp %213 : vector<8x64xi32> to vector<8x64xf32>
    %215 = arith.addf %207, %214 : vector<8x64xf32>
    %c0_67 = arith.constant 0 : index
    %c0_68 = arith.constant 0 : index
    %216 = vector.load %arg7[%c0_67, %c0_68] : memref<8x1xi32, #tpu.memory_space<vmem>>, vector<8x1xi32>
    %c43_i32 = arith.constant 43 : i32
    %217 = vector.broadcast %c43_i32 : i32 to vector<8x1xi32>
    %218 = arith.addi %216, %217 : vector<8x1xi32>
    %219 = vector.broadcast %218 : vector<8x1xi32> to vector<8x64xi32>
    %220 = arith.cmpi eq, %0, %219 : vector<8x64xi32>
    %221 = arith.extui %220 : vector<8x64xi1> to vector<8x64xi32>
    %222 = arith.sitofp %221 : vector<8x64xi32> to vector<8x64xf32>
    %223 = arith.addf %215, %222 : vector<8x64xf32>
    %224 = arith.truncf %223 : vector<8x64xf32> to vector<8x64xbf16>
    %c0_69 = arith.constant 0 : index
    %c0_70 = arith.constant 0 : index
    %225 = vector.load %arg8[%c0_69, %c0_70] : memref<112x16xbf16, #tpu.memory_space<vmem>>, vector<64x16xbf16>
    %cst = arith.constant dense<0.000000e+00> : vector<8x16xf32>
    %226 = tpu.matmul %224, %225, %cst {dimension_numbers = #tpu.dot_dimension_numbers<[1], [0], [0], [1], [0, 0, 1, 1], [], []>} : vector<8x64xbf16>, vector<64x16xbf16>, vector<8x16xf32> -> vector<8x16xf32>
    %c0_71 = arith.constant 0 : index
    %c0_72 = arith.constant 0 : index
    %227 = vector.load %arg9[%c0_71, %c0_72] : memref<8x16xf32, #tpu.memory_space<vmem>>, vector<1x16xf32>
    %228 = vector.broadcast %227 : vector<1x16xf32> to vector<8x16xf32>
    %229 = arith.addf %226, %228 : vector<8x16xf32>
    %cst_73 = arith.constant 0.000000e+00 : f32
    %230 = vector.broadcast %cst_73 : f32 to vector<8x16xf32>
    %231 = arith.maximumf %229, %230 : vector<8x16xf32>
    %232 = arith.truncf %231 : vector<8x16xf32> to vector<8x16xbf16>
    %c64 = arith.constant 64 : index
    %c0_74 = arith.constant 0 : index
    %233 = vector.load %arg8[%c64, %c0_74] : memref<112x16xbf16, #tpu.memory_space<vmem>>, vector<16x16xbf16>
    %cst_75 = arith.constant dense<0.000000e+00> : vector<8x16xf32>
    %234 = tpu.matmul %232, %233, %cst_75 {dimension_numbers = #tpu.dot_dimension_numbers<[1], [0], [0], [1], [0, 0, 1, 1], [], []>} : vector<8x16xbf16>, vector<16x16xbf16>, vector<8x16xf32> -> vector<8x16xf32>
    %c1_76 = arith.constant 1 : index
    %c0_77 = arith.constant 0 : index
    %235 = vector.load %arg9[%c1_76, %c0_77] : memref<8x16xf32, #tpu.memory_space<vmem>>, vector<1x16xf32>
    %236 = vector.broadcast %235 : vector<1x16xf32> to vector<8x16xf32>
    %237 = arith.addf %234, %236 : vector<8x16xf32>
    %cst_78 = arith.constant 0.000000e+00 : f32
    %238 = vector.broadcast %cst_78 : f32 to vector<8x16xf32>
    %239 = arith.maximumf %237, %238 : vector<8x16xf32>
    %240 = arith.truncf %239 : vector<8x16xf32> to vector<8x16xbf16>
    %c80 = arith.constant 80 : index
    %c0_79 = arith.constant 0 : index
    %241 = vector.load %arg8[%c80, %c0_79] : memref<112x16xbf16, #tpu.memory_space<vmem>>, vector<16x16xbf16>
    %cst_80 = arith.constant dense<0.000000e+00> : vector<8x16xf32>
    %242 = tpu.matmul %240, %241, %cst_80 {dimension_numbers = #tpu.dot_dimension_numbers<[1], [0], [0], [1], [0, 0, 1, 1], [], []>} : vector<8x16xbf16>, vector<16x16xbf16>, vector<8x16xf32> -> vector<8x16xf32>
    %c2_81 = arith.constant 2 : index
    %c0_82 = arith.constant 0 : index
    %243 = vector.load %arg9[%c2_81, %c0_82] : memref<8x16xf32, #tpu.memory_space<vmem>>, vector<1x16xf32>
    %244 = vector.broadcast %243 : vector<1x16xf32> to vector<8x16xf32>
    %245 = arith.addf %242, %244 : vector<8x16xf32>
    %cst_83 = arith.constant 0.000000e+00 : f32
    %246 = vector.broadcast %cst_83 : f32 to vector<8x16xf32>
    %247 = arith.maximumf %245, %246 : vector<8x16xf32>
    %248 = arith.truncf %247 : vector<8x16xf32> to vector<8x16xbf16>
    %c96 = arith.constant 96 : index
    %c0_84 = arith.constant 0 : index
    %249 = vector.load %arg8[%c96, %c0_84] : memref<112x16xbf16, #tpu.memory_space<vmem>>, vector<16x16xbf16>
    %cst_85 = arith.constant dense<0.000000e+00> : vector<8x16xf32>
    %250 = tpu.matmul %248, %249, %cst_85 {dimension_numbers = #tpu.dot_dimension_numbers<[1], [0], [0], [1], [0, 0, 1, 1], [], []>} : vector<8x16xbf16>, vector<16x16xbf16>, vector<8x16xf32> -> vector<8x16xf32>
    %c3_86 = arith.constant 3 : index
    %c0_87 = arith.constant 0 : index
    %251 = vector.load %arg9[%c3_86, %c0_87] : memref<8x16xf32, #tpu.memory_space<vmem>>, vector<1x16xf32>
    %252 = vector.broadcast %251 : vector<1x16xf32> to vector<8x16xf32>
    %253 = arith.addf %250, %252 : vector<8x16xf32>
    %254 = arith.truncf %253 : vector<8x16xf32> to vector<8x16xbf16>
    %c0_88 = arith.constant 0 : index
    %c0_89 = arith.constant 0 : index
    %255 = vector.load %arg10[%c0_88, %c0_89] : memref<8x16xbf16, #tpu.memory_space<vmem>>, vector<8x16xbf16>
    tpu.vector_store %arg10[%c0_88, %c0_89], %254 {strides = array<i32>} : memref<8x16xbf16, #tpu.memory_space<vmem>>, vector<8x16xbf16>,
    return
  }
  func.func @transform_0(%arg0: i32) -> (i32, i32) {
    %c0_i32 = arith.constant 0 : i32
    %c0_i32_0 = arith.constant 0 : i32
    return %arg0, %c0_i32 : i32, i32
  }
  func.func @transform_1(%arg0: i32) -> (i32, i32) {
    %c0_i32 = arith.constant 0 : i32
    %c0_i32_0 = arith.constant 0 : i32
    return %arg0, %c0_i32 : i32, i32
  }
  func.func @transform_2(%arg0: i32) -> (i32, i32) {
    %c0_i32 = arith.constant 0 : i32
    %c0_i32_0 = arith.constant 0 : i32
    return %arg0, %c0_i32 : i32, i32
  }
  func.func @transform_3(%arg0: i32) -> (i32, i32) {
    %c0_i32 = arith.constant 0 : i32
    %c0_i32_0 = arith.constant 0 : i32
    return %arg0, %c0_i32 : i32, i32
  }
  func.func @transform_4(%arg0: i32) -> (i32, i32) {
    %c0_i32 = arith.constant 0 : i32
    %c0_i32_0 = arith.constant 0 : i32
    return %arg0, %c0_i32 : i32, i32
  }
  func.func @transform_5(%arg0: i32) -> (i32, i32) {
    %c0_i32 = arith.constant 0 : i32
    %c0_i32_0 = arith.constant 0 : i32
    return %arg0, %c0_i32 : i32, i32
  }
  func.func @transform_6(%arg0: i32) -> (i32, i32) {
    %c0_i32 = arith.constant 0 : i32
    %c0_i32_0 = arith.constant 0 : i32
    return %arg0, %c0_i32 : i32, i32
  }
  func.func @transform_7(%arg0: i32) -> (i32, i32) {
    %c0_i32 = arith.constant 0 : i32
    %c0_i32_0 = arith.constant 0 : i32
    %c0_i32_1 = arith.constant 0 : i32
    return %c0_i32, %c0_i32_0 : i32, i32
  }
  func.func @transform_8(%arg0: i32) -> (i32, i32) {
    %c0_i32 = arith.constant 0 : i32
    %c0_i32_0 = arith.constant 0 : i32
    %c0_i32_1 = arith.constant 0 : i32
    return %c0_i32, %c0_i32_0 : i32, i32
  }
  func.func @transform_9(%arg0: i32) -> (i32, i32) {
    %c0_i32 = arith.constant 0 : i32
    %c0_i32_0 = arith.constant 0 : i32
    return %arg0, %c0_i32 : i32, i32
  }
}

</mosaic_0001>

<bundles_post_ra>
// kernel: youtube_dnn_forward.1
= control target key start
LH: loop header
LB: loop body
LE: loop exit
PB: predicated region body
PF: predicated region fallthrough
CT: control target
= control target key end

     0   :  { %v626_v0 = vmov 0   ;;  %v627_v9 = vmov 0.0   ;;  %v628_v11 = vmov 1   ;;  %v629_v12 = vmov 2   ;;  %s823_s0 = inlined_call_operand.vmem [shape: s32[8,1], index: 0, kind: input, shape index: {}]   ;;  %s824_s2 = inlined_call_operand.vmem [shape: s32[8,8], index: 2, kind: input, shape index: {}]   ;;  %s825_s1 = inlined_call_operand.vmem [shape: s32[8,1], index: 1, kind: input, shape index: {}]   ;;  %s826_s3 = inlined_call_operand.vmem [shape: s32[8,8], index: 3, kind: input, shape index: {}]   ;;  %s827_s4 = inlined_call_operand.vmem [shape: s32[8,8], index: 4, kind: input, shape index: {}]   ;;  %s828_s6 = inlined_call_operand.vmem [shape: s32[8,1], index: 6, kind: input, shape index: {}]   ;;  %s829_s5 = inlined_call_operand.vmem [shape: s32[8,1], index: 5, kind: input, shape index: {}]   ;;  %s830_s7 = inlined_call_operand.vmem [shape: bf16[112,16], index: 7, kind: input, shape index: {}]   ;;  %s831_s8 = inlined_call_operand.vmem [shape: f32[8,16], index: 8, kind: input, shape index: {}]   ;;  %s832_s9 = inlined_call_operand.vmem [shape: bf16[8,16], index: 9, kind: output, shape index: {}]  }
   0x1   :  { %601 = vset.pattern.permute.xlu0 %v626_v0  ;;  %v35_v1 = vld [vmem:[%s823_s0] sm:$0xff]  ;;  %602 = vset.pattern.permute.xlu1 %v626_v0  ;;  %v630_v13 = vmov 3   ;;  %v631_v14 = vmov 4   ;;  %v632_v15 = vmov 5   ;;  %v633_v16 = vmov 6   ;;  %v620_v22 = vld [vmem:[%s830_s7 + $0x8] sm:$0xff]  }
   0x2   :  { %v51_v2 = vld [vmem:[%s824_s2] sm:$0xff]  ;;  %37 = vperm.xlu0 %601, %v35_v1   ;;  %561 = vmatprep.subr.bf16.mxu0 %v627_v9  ;;  %v634_v18 = vmov 7   ;;  %v621_v24 = vld [vmem:[%s830_s7 + $0x10] sm:$0xff]   ;;  %v622_v25 = vld [vmem:[%s830_s7 + $0x18] sm:$0xff]   ;;  %vm635_vm0 = vmmov 0   ;;  %v33_v26 = vlaneseq }
   0x3   :  { %v42_v3 = vld [vmem:[%s825_s1] sm:$0xff]  ;;  %v52_v4 = vadd.s32 8, %v51_v2  ;;  %573 = vmatprep.subr.bf16.mxu1 %v627_v9  ;;  %569 = vmatprep.mubr.msk.bf16.mxu0 %vm635_vm0, %v627_v9 }
   0x4   :  { %v43_v5 = vadd.s32 3, %v42_v3  ;;  %v60_v6 = vld [vmem:[%s826_s3] sm:$0xff]  ;;  %575 = vmatprep.mubr.msk.bf16.mxu1 %vm635_vm0, %v627_v9  ;;  %v732_v27 = vand.u32 127, %v33_v26 }
   0x5   :  { %v69_v7 = vld [vmem:[%s827_s4] sm:$0xff]  ;;  %54 = vperm.xlu1 %602, %v52_v4   ;;  %v61_v8 = vadd.s32 19, %v60_v6 }
   0x6   :  { %45 = vperm.xlu0 %601, %v43_v5   ;;  %v70_v10 = vadd.s32 27, %v69_v7  ;;  %v234_v17 = vld [vmem:[%s828_s6] sm:$0xff] }
   0x7   :  { %v235_v19 = vadd.s32 43, %v234_v17  ;;  %v225_v20 = vld [vmem:[%s829_s5] sm:$0xff] }
   0x8   :  { %v619_v21 = vld [vmem:[%s830_s7] sm:$0xff]   ;;  %v226_v23 = vadd.s32 32, %v225_v20 }
   0x9   :  { %63 = vperm.xlu1 %602, %v61_v8   ;;  %562 = vmatpush3.bf16.msra.mxu0 %v619_v21 }
   0xa   :  { %72 = vperm.xlu0 %601, %v70_v10   ;;  %563 = vmatprep.subr.bf16.mxu0 %v627_v9 }
   0xd   :  { %603 = vset.pattern.permute.xlu1 %v628_v11  ;;  %564 = vmatpush3.bf16.msra.mxu0 %v620_v22 }
   0xe   :  { %79 = vperm.xlu1 %603, %v52_v4   ;;  %604 = vset.pattern.permute.xlu0 %v628_v11 }
   0xf   :  { %86 = vperm.xlu0 %604, %v61_v8   ;;  %565 = vmatprep.subr.bf16.mxu0 %v627_v9 }
  0x11   :  { %566 = vmatpush3.bf16.msra.mxu0 %v621_v24 }
  0x12   :  { %93 = vperm.xlu1 %603, %v70_v10   ;;  %567 = vmatprep.subr.bf16.mxu0 %v627_v9 }
  0x13   :  { %606 = vset.pattern.permute.xlu0 %v629_v12 }
  0x14   :  { %107 = vperm.xlu0 %606, %v61_v8  }
  0x15   :  { %568 = vmatpush3.bf16.msra.mxu0 %v622_v25 }
  0x16   :  { %605 = vset.pattern.permute.xlu1 %v629_v12 }
  0x17   :  { %100 = vperm.xlu1 %605, %v52_v4  }
  0x18   :  { %608 = vset.pattern.permute.xlu0 %v630_v13 }
  0x19   :  { %128 = vperm.xlu0 %608, %v61_v8  }
  0x1b   :  { %114 = vperm.xlu1 %605, %v70_v10  }
  0x1d   :  { %610 = vset.pattern.permute.xlu0 %v631_v14 }
  0x1e   :  { %149 = vperm.xlu0 %610, %v61_v8  }
  0x1f   :  { %607 = vset.pattern.permute.xlu1 %v630_v13 }
  0x20   :  { %121 = vperm.xlu1 %607, %v52_v4  }
  0x22   :  { %612 = vset.pattern.permute.xlu0 %v632_v15 }
  0x23   :  { %170 = vperm.xlu0 %612, %v61_v8  }
  0x24   :  { %135 = vperm.xlu1 %607, %v70_v10  }
  0x27   :  { %614 = vset.pattern.permute.xlu0 %v633_v16 }
  0x28   :  { %609 = vset.pattern.permute.xlu1 %v631_v14  ;;  %191 = vperm.xlu0 %614, %v61_v8  }
  0x29   :  { %142 = vperm.xlu1 %609, %v52_v4  }
  0x2c   :  { %616 = vset.pattern.permute.xlu0 %v634_v18 }
  0x2d   :  { %156 = vperm.xlu1 %609, %v70_v10   ;;  %212 = vperm.xlu0 %616, %v61_v8  }
  0x31   :  { %611 = vset.pattern.permute.xlu1 %v632_v15  ;;  %618 = vset.pattern.permute.xlu0 %v626_v0 }
  0x32   :  { %163 = vperm.xlu1 %611, %v52_v4   ;;  %237 = vperm.xlu0 %618, %v235_v19  }
  0x36   :  { %177 = vperm.xlu1 %611, %v70_v10  }
  0x3a   :  { %613 = vset.pattern.permute.xlu1 %v633_v16 }
  0x3b   :  { %184 = vperm.xlu1 %613, %v52_v4  }
  0x3f   :  { %198 = vperm.xlu1 %613, %v70_v10  }
  0x43   :  { %615 = vset.pattern.permute.xlu1 %v634_v18 }
  0x44   :  { %205 = vperm.xlu1 %615, %v52_v4  }
  0x48   :  { %219 = vperm.xlu1 %615, %v70_v10  }
  0x4c   :  { %617 = vset.pattern.permute.xlu1 %v626_v0 }
  0x4d   :  { %228 = vperm.xlu1 %617, %v226_v23  }
  0x81   :  { %v38_v28 = vpop.permute.xlu0 %37 }
  0x82   :  { %vm39_vm1 = vcmp.eq.s32.totalorder %v732_v27, %v38_v28 }
  0x83   :  { %v507_v30 = vsel %vm39_vm1, 1.0, %v627_v9 }
  0x84   :  { %v55_v29 = vpop.permute.xlu1 %54 }
  0x85   :  { %v46_v31 = vpop.permute.xlu0 %45  ;;  %vm56_vm2 = vcmp.eq.s32.totalorder %v732_v27, %v55_v29 }
  0x86   :  { %vm47_vm3 = vcmp.eq.s32.totalorder %v732_v27, %v46_v31  ;;  %v509_v35 = vsel %vm56_vm2, 1.0, %v627_v9 }
  0x87   :  { %v508_v32 = vsel %vm47_vm3, 1.0, %v627_v9 }
  0x88   :  { %v64_v33 = vpop.permute.xlu1 %63  ;;  %v50_v34 = vadd.f32 %v508_v32, %v507_v30 }
  0x89   :  { %vm65_vm4 = vcmp.eq.s32.totalorder %v732_v27, %v64_v33  ;;  %v73_v36 = vpop.permute.xlu0 %72 }
  0x8a   :  { %v59_v37 = vadd.f32 %v509_v35, %v50_v34  ;;  %vm74_vm5 = vcmp.eq.s32.totalorder %v732_v27, %v73_v36  ;;  %v510_v38 = vsel %vm65_vm4, 1.0, %v627_v9 }
  0x8b   :  { %v511_v39 = vsel %vm74_vm5, 1.0, %v627_v9 }
  0x8c   :  { %v68_v40 = vadd.f32 %v510_v38, %v59_v37 }
  0x8d   :  { %v80_v41 = vpop.permute.xlu1 %79 }
  0x8e   :  { %vm81_vm6 = vcmp.eq.s32.totalorder %v732_v27, %v80_v41  ;;  %v77_v42 = vadd.f32 %v511_v39, %v68_v40  ;;  %v87_v44 = vpop.permute.xlu0 %86 }
  0x8f   :  { %v512_v43 = vsel %vm81_vm6, 1.0, %v627_v9  ;;  %vm88_vm7 = vcmp.eq.s32.totalorder %v732_v27, %v87_v44 }
  0x90   :  { %v84_v45 = vadd.f32 %v512_v43, %v77_v42  ;;  %v513_v46 = vsel %vm88_vm7, 1.0, %v627_v9 }
  0x91   :  { %v94_v47 = vpop.permute.xlu1 %93 }
  0x92   :  { %vm95_vm8 = vcmp.eq.s32.totalorder %v732_v27, %v94_v47  ;;  %v91_v48 = vadd.f32 %v513_v46, %v84_v45 }
  0x93   :  { %v514_v49 = vsel %vm95_vm8, 1.0, %v627_v9  ;;  %v108_v50 = vpop.permute.xlu0 %107 }
  0x94   :  { %vm109_vm9 = vcmp.eq.s32.totalorder %v732_v27, %v108_v50  ;;  %v98_v52 = vadd.f32 %v514_v49, %v91_v48  ;;  %v623_v50 = vld [vmem:[%s830_s7 + $0x20] sm:$0xff]  }
  0x95   :  { %v516_v55 = vsel %vm109_vm9, 1.0, %v627_v9  ;;  %574 = vmatpush3.bf16.msra.mxu1 %v623_v50 }
  0x96   :  { %v101_v51 = vpop.permute.xlu1 %100  ;;  %579 = vmatprep.subr.bf16.mxu1 %v627_v9 }
  0x97   :  { %vm102_vm10 = vcmp.eq.s32.totalorder %v732_v27, %v101_v51 }
  0x98   :  { %v515_v53 = vsel %vm102_vm10, 1.0, %v627_v9  ;;  %v129_v58 = vpop.permute.xlu0 %128 }
  0x99   :  { %v105_v54 = vadd.f32 %v515_v53, %v98_v52  ;;  %vm130_vm12 = vcmp.eq.s32.totalorder %v732_v27, %v129_v58 }
  0x9a   :  { %v115_v56 = vpop.permute.xlu1 %114  ;;  %v519_v0 = vsel %vm130_vm12, 1.0, %v627_v9 }
  0x9b   :  { %vm116_vm11 = vcmp.eq.s32.totalorder %v732_v27, %v115_v56  ;;  %v112_v57 = vadd.f32 %v516_v55, %v105_v54 }
  0x9c   :  { %v517_v59 = vsel %vm116_vm11, 1.0, %v627_v9 }
  0x9d   :  { %v119_v61 = vadd.f32 %v517_v59, %v112_v57  ;;  %v150_v3 = vpop.permute.xlu0 %149  ;;  %v624_v57 = vld [vmem:[%s830_s7 + $0x28] sm:$0xff]   ;;  %v541_v59 = vld [vmem:[%s831_s8 + $0x1] ss:$0 sm:$0xff] }
  0x9e   :  { %vm151_vm15 = vcmp.eq.s32.totalorder %v732_v27, %v150_v3 }
  0x9f   :  { %v122_v60 = vpop.permute.xlu1 %121  ;;  %v522_v10 = vsel %vm151_vm15, 1.0, %v627_v9  ;;  %vm340_vm15 = vcmask 130048  }
  0xa0   :  { %vm123_vm13 = vcmp.eq.s32.totalorder %v732_v27, %v122_v60 }
  0xa1   :  { %v518_v62 = vsel %vm123_vm13, 1.0, %v627_v9 }
  0xa2   :  { %v126_v63 = vadd.f32 %v518_v62, %v119_v61  ;;  %v171_v13 = vpop.permute.xlu0 %170 }
  0xa3   :  { %v136_v1 = vpop.permute.xlu1 %135  ;;  %vm172_vm3 = vcmp.eq.s32.totalorder %v732_v27, %v171_v13  ;;  %v547_v13 = vld [vmem:[%s831_s8 + $0x3] ss:$0 sm:$0xff] }
  0xa4   :  { %vm137_vm14 = vcmp.eq.s32.totalorder %v732_v27, %v136_v1  ;;  %v133_v2 = vadd.f32 %v519_v0, %v126_v63  ;;  %v525_v19 = vsel %vm172_vm3, 1.0, %v627_v9 }
  0xa5   :  { %v520_v4 = vsel %vm137_vm14, 1.0, %v627_v9  ;;  %vm281_vm14 = vcmask 523264  }
  0xa6   :  { %v140_v6 = vadd.f32 %v520_v4, %v133_v2  ;;  %v625_v2 = vld [vmem:[%s830_s7 + $0x30] sm:$0xff]   ;;  %v544_v4 = vld [vmem:[%s831_s8 + $0x2] ss:$0 sm:$0xff] }
  0xa7   :  { %v192_v22 = vpop.permute.xlu0 %191 }
  0xa8   :  { %v143_v5 = vpop.permute.xlu1 %142  ;;  %vm193_vm6 = vcmp.eq.s32.totalorder %v732_v27, %v192_v22 }
  0xa9   :  { %vm144_vm1 = vcmp.eq.s32.totalorder %v732_v27, %v143_v5  ;;  %v528_v29 = vsel %vm193_vm6, 1.0, %v627_v9 }
  0xaa   :  { %v521_v7 = vsel %vm144_vm1, 1.0, %v627_v9 }
  0xab   :  { %v147_v8 = vadd.f32 %v521_v7, %v140_v6 }
  0xac   :  { %v157_v11 = vpop.permute.xlu1 %156  ;;  %v213_v32 = vpop.permute.xlu0 %212 }
  0xad   :  { %vm158_vm2 = vcmp.eq.s32.totalorder %v732_v27, %v157_v11  ;;  %v154_v12 = vadd.f32 %v522_v10, %v147_v8  ;;  %vm214_vm9 = vcmp.eq.s32.totalorder %v732_v27, %v213_v32 }
  0xae   :  { %v523_v14 = vsel %vm158_vm2, 1.0, %v627_v9  ;;  %v531_v38 = vsel %vm214_vm9, 1.0, %v627_v9 }
  0xaf   :  { %v161_v16 = vadd.f32 %v523_v14, %v154_v12 }
  0xb1   :  { %v164_v15 = vpop.permute.xlu1 %163  ;;  %v238_v40 = vpop.permute.xlu0 %237 }
  0xb2   :  { %vm165_vm4 = vcmp.eq.s32.totalorder %v732_v27, %v164_v15  ;;  %vm239_vm12 = vcmp.eq.s32.totalorder %v732_v27, %v238_v40 }
  0xb3   :  { %v524_v17 = vsel %vm165_vm4, 1.0, %v627_v9  ;;  %v534_v46 = vsel %vm239_vm12, 1.0, %v627_v9 }
  0xb4   :  { %v168_v18 = vadd.f32 %v524_v17, %v161_v16 }
  0xb5   :  { %v178_v20 = vpop.permute.xlu1 %177 }
  0xb6   :  { %vm179_vm5 = vcmp.eq.s32.totalorder %v732_v27, %v178_v20  ;;  %v175_v21 = vadd.f32 %v525_v19, %v168_v18 }
  0xb7   :  { %v526_v23 = vsel %vm179_vm5, 1.0, %v627_v9 }
  0xb8   :  { %v182_v25 = vadd.f32 %v526_v23, %v175_v21 }
  0xba   :  { %v185_v24 = vpop.permute.xlu1 %184 }
  0xbb   :  { %vm186_vm7 = vcmp.eq.s32.totalorder %v732_v27, %v185_v24 }
  0xbc   :  { %v527_v26 = vsel %vm186_vm7, 1.0, %v627_v9 }
  0xbd   :  { %v189_v28 = vadd.f32 %v527_v26, %v182_v25 }
  0xbe   :  { %v199_v30 = vpop.permute.xlu1 %198 }
  0xbf   :  { %vm200_vm8 = vcmp.eq.s32.totalorder %v732_v27, %v199_v30  ;;  %v196_v31 = vadd.f32 %v528_v29, %v189_v28 }
  0xc0   :  { %v529_v33 = vsel %vm200_vm8, 1.0, %v627_v9 }
  0xc1   :  { %v203_v35 = vadd.f32 %v529_v33, %v196_v31 }
  0xc3   :  { %v206_v34 = vpop.permute.xlu1 %205 }
  0xc4   :  { %vm207_vm10 = vcmp.eq.s32.totalorder %v732_v27, %v206_v34 }
  0xc5   :  { %v530_v36 = vsel %vm207_vm10, 1.0, %v627_v9 }
  0xc6   :  { %v210_v37 = vadd.f32 %v530_v36, %v203_v35 }
  0xc7   :  { %v220_v39 = vpop.permute.xlu1 %219 }
  0xc8   :  { %vm221_vm11 = vcmp.eq.s32.totalorder %v732_v27, %v220_v39  ;;  %v217_v41 = vadd.f32 %v531_v38, %v210_v37 }
  0xc9   :  { %v532_v42 = vsel %vm221_vm11, 1.0, %v627_v9 }
  0xca   :  { %v224_v44 = vadd.f32 %v532_v42, %v217_v41 }
  0xcc   :  { %v229_v43 = vpop.permute.xlu1 %228 }
  0xcd   :  { %vm230_vm13 = vcmp.eq.s32.totalorder %v732_v27, %v229_v43  ;;  %v535_v27 = vld [vmem:[%s831_s8] ss:$0 sm:$0xff] }
  0xce   :  { %v533_v45 = vsel %vm230_vm13, 1.0, %v627_v9 }
  0xcf   :  { %v233_v47 = vadd.f32 %v533_v45, %v224_v44 }
  0xd1   :  { %v242_v48 = vadd.f32 %v534_v46, %v233_v47 }
  0xd3   :  { %v243_v49 = vpack.c.bf16 %v242_v48, %v242_v48 }
  0xd5   :  { %570 = vmatmul.mubr.msk.bf16.vlgmr.msra.gmra.mrb[0].mxu0 %vm281_vm14, %v243_v49 }
 0x1a8   :  { %v319_v51 = vpop.f32.mrb[0].mxu0 }
 0x1a9   :  { %v320_v52 = vadd.f32 %v535_v27, %v319_v51  ;;  %v571_v53 = vpop.f32.mrb[1].mxu0 }
 0x1aa   :  { %v322_v54 = vpop.f32.mrb[2].mxu0 }
 0x1ab   :  { %v325_v55 = vmax.f32 %v320_v52, 0.0  ;;  %v572_v56 = vpop.f32.mrb[3].mxu0 }
 0x1ad   :  { %v326_v58 = vpack.c.bf16 %v325_v55, %v325_v55 }
 0x1af   :  { %576 = vmatmul.mubr.msk.bf16.vlgmr.msra.gmra.mrb[0].mxu1 %vm340_vm15, %v326_v58 }
 0x1b0   :  { %580 = vmatpush3.bf16.msra.mxu1 %v624_v57  ;;  %581 = vmatprep.mubr.msk.bf16.mxu1 %vm635_vm0, %v627_v9 }
 0x1b1   :  { %585 = vmatprep.subr.bf16.mxu1 %v627_v9 }
 0x282   :  { %v378_v60 = vpop.f32.mrb[0].mxu1 }
 0x283   :  { %v379_v61 = vadd.f32 %v541_v59, %v378_v60  ;;  %v577_v62 = vpop.f32.mrb[1].mxu1 }
 0x284   :  { %v381_v63 = vpop.f32.mrb[2].mxu1 }
 0x285   :  { %v384_v0 = vmax.f32 %v379_v61, 0.0  ;;  %v578_v1 = vpop.f32.mrb[3].mxu1 }
 0x287   :  { %v385_v3 = vpack.c.bf16 %v384_v0, %v384_v0 }
 0x289   :  { %582 = vmatmul.mubr.msk.bf16.vlgmr.msra.gmra.mrb[4].mxu1 %vm340_vm15, %v385_v3 }
 0x28a   :  { %586 = vmatpush3.bf16.msra.mxu1 %v625_v2  ;;  %587 = vmatprep.mubr.msk.bf16.mxu1 %vm635_vm0, %v627_v9  ;;  %vm501_vm0 = vcmask 125952  }
 0x35c   :  { %v436_v5 = vpop.f32.mrb[4].mxu1 }
 0x35d   :  { %v437_v6 = vadd.f32 %v544_v4, %v436_v5  ;;  %v583_v7 = vpop.f32.mrb[5].mxu1 }
 0x35e   :  { %v439_v8 = vpop.f32.mrb[6].mxu1 }
 0x35f   :  { %v442_v10 = vmax.f32 %v437_v6, 0.0  ;;  %v584_v11 = vpop.f32.mrb[7].mxu1 }
 0x361   :  { %v443_v12 = vpack.c.bf16 %v442_v10, %v442_v10 }
 0x363   :  { %588 = vmatmul.mubr.msk.bf16.vlgmr.msra.gmra.mrb[8].mxu1 %vm340_vm15, %v443_v12 }
 0x436   :  { %v494_v14 = vpop.f32.mrb[8].mxu1 }
 0x437   :  { %v495_v15 = vadd.f32 %v547_v13, %v494_v14  ;;  %v589_v9 = vpop.f32.mrb[9].mxu1 }
 0x438   :  { %v497_v16 = vpop.f32.mrb[10].mxu1 }
 0x439   :  { %v500_v17 = vpack.c.bf16 %v495_v15, %v495_v15  ;;  %v590_v18 = vpop.f32.mrb[11].mxu1 }
 0x43b   :  { %502 = vst.msk [vmem:[%s832_s9] sm:$0xf] %vm501_vm0, %v500_v17 }

</bundles_post_ra>
